<compile_context>
chip_gen: v6e
topology: v6e:2x2x1
jax: 0.10.0
libtpu: 0.0.40
codegen_flags: <defaults>
</compile_context>

<pallas_src>
import math

import jax
import jax.numpy as jnp
from jax import lax
from jax.experimental import pallas as pl
from jax.experimental.pallas import tpu as pltpu


# ----------------------------------------------------------------------------
# Fused kernel: LSTM recurrence + pair dot-product head.
# ----------------------------------------------------------------------------
def task_lstm_forward(x, ind1, ind2, w_ih, w_hh, b_ih, b_hh):
    """x: (T, B, D) f32 time-major; ind1/ind2: (P,) int32; returns (P,) f32."""
    T, B, D = x.shape
    H = w_hh.shape[1]
    P = ind1.shape[0]

    wih_t = jnp.transpose(w_ih)                  # (D, 4H)
    whh_t = jnp.transpose(w_hh)                  # (H, 4H)
    b2d = (b_ih + b_hh).reshape(1, 4 * H)        # (1, 4H)
    x2d = x.reshape(T * B, D)                    # (T*B, D): one big matmul operand
    ind1 = ind1.astype(jnp.int32)
    ind2 = ind2.astype(jnp.int32)

    def kernel(ind1_ref, ind2_ref, x_ref, wih_ref, whh_ref, b_ref,
               out_ref, h_sc):
        # ---- Hoisted input projection: ONE MXU op for all T steps. ----
        xw = jnp.dot(x_ref[...], wih_ref[...],
                     preferred_element_type=jnp.float32) + b_ref[...]  # (T*B, 4H)
        whh = whh_ref[...]                                             # (H, 4H)

        h = jnp.zeros((B, H), jnp.float32)
        c = jnp.zeros((B, H), jnp.float32)

        # ---- Serial recurrence: only h @ W_hh^T per step (T static -> unrolled). ----
        for t in range(T):
            gates = xw[t * B:(t + 1) * B, :] + jnp.dot(
                h, whh, preferred_element_type=jnp.float32)            # (B, 4H)
            i_g = jax.nn.sigmoid(gates[:, 0 * H:1 * H])
            f_g = jax.nn.sigmoid(gates[:, 1 * H:2 * H])
            g_g = jnp.tanh(gates[:, 2 * H:3 * H])
            o_g = jax.nn.sigmoid(gates[:, 3 * H:4 * H])
            c = f_g * c + i_g * g_g
            h = o_g * jnp.tanh(c)

        # ---- Fused pair head: gather rows of h_T via SMEM indices. ----
        # Dropout -> identity (eval mode).
        h_sc[...] = h
        a_rows = []
        b_rows = []
        for p in range(P):
            a_rows.append(h_sc[pl.ds(ind1_ref[p], 1), :])   # (1, H)
            b_rows.append(h_sc[pl.ds(ind2_ref[p], 1), :])   # (1, H)
        a = jnp.concatenate(a_rows, axis=0)                 # (P, H)
        b = jnp.concatenate(b_rows, axis=0)                 # (P, H)
        s = jnp.sum(a * b, axis=1, keepdims=True)           # (P, 1)
        out_ref[...] = jax.nn.sigmoid(s)

    out = pl.pallas_call(
        kernel,
        out_shape=jax.ShapeDtypeStruct((P, 1), jnp.float32),
        grid_spec=pltpu.PrefetchScalarGridSpec(
            num_scalar_prefetch=2,          # ind1, ind2 -> SMEM
            grid=(1,),
            in_specs=[
                pl.BlockSpec((T * B, D), lambda i, i1, i2: (0, 0)),
                pl.BlockSpec((D, 4 * H), lambda i, i1, i2: (0, 0)),
                pl.BlockSpec((H, 4 * H), lambda i, i1, i2: (0, 0)),
                pl.BlockSpec((1, 4 * H), lambda i, i1, i2: (0, 0)),
            ],
            out_specs=pl.BlockSpec((P, 1), lambda i, i1, i2: (0, 0)),
            scratch_shapes=[pltpu.VMEM((B, H), jnp.float32)],
        ),
        compiler_params=pltpu.CompilerParams(
            dimension_semantics=("arbitrary",),
        ),
    )(ind1, ind2, x2d, wih_t, whh_t, b2d)
    return out[:, 0]


# ----------------------------------------------------------------------------
# Pure-JAX reference (for correctness check only).
# ----------------------------------------------------------------------------
def task_lstm_reference(x, ind1, ind2, w_ih, w_hh, b_ih, b_hh):
    T, B, D = x.shape
    H = w_hh.shape[1]

    def step(carry, x_t):
        h, c = carry
        gates = x_t @ w_ih.T + h @ w_hh.T + b_ih + b_hh
        i_g = jax.nn.sigmoid(gates[:, 0 * H:1 * H])
        f_g = jax.nn.sigmoid(gates[:, 1 * H:2 * H])
        g_g = jnp.tanh(gates[:, 2 * H:3 * H])
        o_g = jax.nn.sigmoid(gates[:, 3 * H:4 * H])
        c = f_g * c + i_g * g_g
        h = o_g * jnp.tanh(c)
        return (h, c), None

    init = (jnp.zeros((B, H), jnp.float32), jnp.zeros((B, H), jnp.float32))
    (h, _), _ = lax.scan(step, init, x)
    pred = jnp.sum(h[ind1, :] * h[ind2, :], axis=1)
    return jax.nn.sigmoid(pred)


if __name__ == "__main__":
    T, B, D, H, P = 8, 8, 16, 32, 8   # seq, batch, in_dim, hidden_dim, num pairs

    key = jax.random.PRNGKey(0)
    kx, ki1, ki2, kw1, kw2, kb1, kb2 = jax.random.split(key, 7)

    x = jax.random.normal(kx, (T, B, D), jnp.float32)
    ind1 = jax.random.randint(ki1, (P,), 0, B, dtype=jnp.int32)
    ind2 = jax.random.randint(ki2, (P,), 0, B, dtype=jnp.int32)

    # PyTorch nn.LSTM init: U(-1/sqrt(H), 1/sqrt(H)) for all weights/biases.
    bound = 1.0 / math.sqrt(H)
    w_ih = jax.random.uniform(kw1, (4 * H, D), jnp.float32, -bound, bound)
    w_hh = jax.random.uniform(kw2, (4 * H, H), jnp.float32, -bound, bound)
    b_ih = jax.random.uniform(kb1, (4 * H,), jnp.float32, -bound, bound)
    b_hh = jax.random.uniform(kb2, (4 * H,), jnp.float32, -bound, bound)

    out = task_lstm_forward(x, ind1, ind2, w_ih, w_hh, b_ih, b_hh)
    out = jax.block_until_ready(out)

    ref = task_lstm_reference(x, ind1, ind2, w_ih, w_hh, b_ih, b_hh)
    assert out.shape == (P,)
    assert jnp.allclose(out, ref, rtol=1e-4, atol=1e-5), (out, ref)

    print("KERNEL_OK")
</pallas_src>

<mosaic_0001>
module attributes {stable_mosaic.version = 11 : i64} {
  func.func @kernel(%arg0: i32, %arg1: memref<8xi32, #tpu.memory_space<smem>>, %arg2: memref<8xi32, #tpu.memory_space<smem>>, %arg3: memref<64x16xf32, #tpu.memory_space<vmem>>, %arg4: memref<16x128xf32, #tpu.memory_space<vmem>>, %arg5: memref<32x128xf32, #tpu.memory_space<vmem>>, %arg6: memref<1x128xf32, #tpu.memory_space<vmem>>, %arg7: memref<8x1xf32, #tpu.memory_space<vmem>>, %arg8: memref<8x32xf32, #tpu.memory_space<vmem>>) attributes {dimension_semantics = [#tpu.dimension_semantics<arbitrary>], iteration_bounds = array<i64: 1>, scalar_prefetch = 2 : i64, scratch_operands = 1 : i64, tpu.core_type = #tpu.core_type<tc>, window_params = [{pipeline_mode = #tpu.pipeline_mode<synchronous>, transform_indices = @transform_0, window_bounds = array<i64: 64, 16>}, {pipeline_mode = #tpu.pipeline_mode<synchronous>, transform_indices = @transform_1, window_bounds = array<i64: 16, 128>}, {pipeline_mode = #tpu.pipeline_mode<synchronous>, transform_indices = @transform_2, window_bounds = array<i64: 32, 128>}, {pipeline_mode = #tpu.pipeline_mode<synchronous>, transform_indices = @transform_3, window_bounds = array<i64: 1, 128>}, {pipeline_mode = #tpu.pipeline_mode<synchronous>, transform_indices = @transform_4, window_bounds = array<i64: 8, 1>}]} {
    %c0 = arith.constant 0 : index
    %c0_0 = arith.constant 0 : index
    %0 = vector.load %arg3[%c0, %c0_0] : memref<64x16xf32, #tpu.memory_space<vmem>>, vector<64x16xf32>
    %c0_1 = arith.constant 0 : index
    %c0_2 = arith.constant 0 : index
    %1 = vector.load %arg4[%c0_1, %c0_2] : memref<16x128xf32, #tpu.memory_space<vmem>>, vector<16x128xf32>
    %cst = arith.constant dense<0.000000e+00> : vector<64x128xf32>
    %2 = tpu.matmul %0, %1, %cst {dimension_numbers = #tpu.dot_dimension_numbers<[1], [0], [0], [1], [0, 0, 1, 1], [], []>} : vector<64x16xf32>, vector<16x128xf32>, vector<64x128xf32> -> vector<64x128xf32>
    %c0_3 = arith.constant 0 : index
    %c0_4 = arith.constant 0 : index
    %3 = vector.load %arg6[%c0_3, %c0_4] : memref<1x128xf32, #tpu.memory_space<vmem>>, vector<1x128xf32>
    %4 = vector.broadcast %3 : vector<1x128xf32> to vector<64x128xf32>
    %5 = arith.addf %2, %4 : vector<64x128xf32>
    %c0_5 = arith.constant 0 : index
    %c0_6 = arith.constant 0 : index
    %6 = vector.load %arg5[%c0_5, %c0_6] : memref<32x128xf32, #tpu.memory_space<vmem>>, vector<32x128xf32>
    %cst_7 = arith.constant 0.000000e+00 : f32
    %7 = vector.broadcast %cst_7 : f32 to vector<8x32xf32>
    %cst_8 = arith.constant 0.000000e+00 : f32
    %8 = vector.broadcast %cst_8 : f32 to vector<8x32xf32>
    %9 = vector.extract_strided_slice %5 {offsets = [0, 0], sizes = [8, 128], strides = [1, 1]} : vector<64x128xf32> to vector<8x128xf32>
    %cst_9 = arith.constant dense<0.000000e+00> : vector<8x128xf32>
    %10 = tpu.matmul %7, %6, %cst_9 {dimension_numbers = #tpu.dot_dimension_numbers<[1], [0], [0], [1], [0, 0, 1, 1], [], []>} : vector<8x32xf32>, vector<32x128xf32>, vector<8x128xf32> -> vector<8x128xf32>
    %11 = arith.addf %9, %10 : vector<8x128xf32>
    %12 = vector.extract_strided_slice %11 {offsets = [0, 0], sizes = [8, 32], strides = [1, 1]} : vector<8x128xf32> to vector<8x32xf32>
    %13 = arith.negf %12 : vector<8x32xf32>
    %14 = math.exp %13 : vector<8x32xf32>
    %cst_10 = arith.constant 1.000000e+00 : f32
    %15 = vector.broadcast %cst_10 : f32 to vector<8x32xf32>
    %16 = arith.addf %15, %14 : vector<8x32xf32>
    %17 = arith.divf %15, %16 : vector<8x32xf32>
    %18 = vector.extract_strided_slice %11 {offsets = [0, 32], sizes = [8, 32], strides = [1, 1]} : vector<8x128xf32> to vector<8x32xf32>
    %19 = arith.negf %18 : vector<8x32xf32>
    %20 = math.exp %19 : vector<8x32xf32>
    %cst_11 = arith.constant 1.000000e+00 : f32
    %21 = vector.broadcast %cst_11 : f32 to vector<8x32xf32>
    %22 = arith.addf %21, %20 : vector<8x32xf32>
    %23 = arith.divf %21, %22 : vector<8x32xf32>
    %24 = vector.extract_strided_slice %11 {offsets = [0, 64], sizes = [8, 32], strides = [1, 1]} : vector<8x128xf32> to vector<8x32xf32>
    %25 = math.tanh %24 : vector<8x32xf32>
    %26 = vector.extract_strided_slice %11 {offsets = [0, 96], sizes = [8, 32], strides = [1, 1]} : vector<8x128xf32> to vector<8x32xf32>
    %27 = arith.negf %26 : vector<8x32xf32>
    %28 = math.exp %27 : vector<8x32xf32>
    %cst_12 = arith.constant 1.000000e+00 : f32
    %29 = vector.broadcast %cst_12 : f32 to vector<8x32xf32>
    %30 = arith.addf %29, %28 : vector<8x32xf32>
    %31 = arith.divf %29, %30 : vector<8x32xf32>
    %32 = arith.mulf %23, %8 : vector<8x32xf32>
    %33 = arith.mulf %17, %25 : vector<8x32xf32>
    %34 = arith.addf %32, %33 : vector<8x32xf32>
    %35 = math.tanh %34 : vector<8x32xf32>
    %36 = arith.mulf %31, %35 : vector<8x32xf32>
    %37 = vector.extract_strided_slice %5 {offsets = [8, 0], sizes = [8, 128], strides = [1, 1]} : vector<64x128xf32> to vector<8x128xf32>
    %cst_13 = arith.constant dense<0.000000e+00> : vector<8x128xf32>
    %38 = tpu.matmul %36, %6, %cst_13 {dimension_numbers = #tpu.dot_dimension_numbers<[1], [0], [0], [1], [0, 0, 1, 1], [], []>} : vector<8x32xf32>, vector<32x128xf32>, vector<8x128xf32> -> vector<8x128xf32>
    %39 = arith.addf %37, %38 : vector<8x128xf32>
    %40 = vector.extract_strided_slice %39 {offsets = [0, 0], sizes = [8, 32], strides = [1, 1]} : vector<8x128xf32> to vector<8x32xf32>
    %41 = arith.negf %40 : vector<8x32xf32>
    %42 = math.exp %41 : vector<8x32xf32>
    %cst_14 = arith.constant 1.000000e+00 : f32
    %43 = vector.broadcast %cst_14 : f32 to vector<8x32xf32>
    %44 = arith.addf %43, %42 : vector<8x32xf32>
    %45 = arith.divf %43, %44 : vector<8x32xf32>
    %46 = vector.extract_strided_slice %39 {offsets = [0, 32], sizes = [8, 32], strides = [1, 1]} : vector<8x128xf32> to vector<8x32xf32>
    %47 = arith.negf %46 : vector<8x32xf32>
    %48 = math.exp %47 : vector<8x32xf32>
    %cst_15 = arith.constant 1.000000e+00 : f32
    %49 = vector.broadcast %cst_15 : f32 to vector<8x32xf32>
    %50 = arith.addf %49, %48 : vector<8x32xf32>
    %51 = arith.divf %49, %50 : vector<8x32xf32>
    %52 = vector.extract_strided_slice %39 {offsets = [0, 64], sizes = [8, 32], strides = [1, 1]} : vector<8x128xf32> to vector<8x32xf32>
    %53 = math.tanh %52 : vector<8x32xf32>
    %54 = vector.extract_strided_slice %39 {offsets = [0, 96], sizes = [8, 32], strides = [1, 1]} : vector<8x128xf32> to vector<8x32xf32>
    %55 = arith.negf %54 : vector<8x32xf32>
    %56 = math.exp %55 : vector<8x32xf32>
    %cst_16 = arith.constant 1.000000e+00 : f32
    %57 = vector.broadcast %cst_16 : f32 to vector<8x32xf32>
    %58 = arith.addf %57, %56 : vector<8x32xf32>
    %59 = arith.divf %57, %58 : vector<8x32xf32>
    %60 = arith.mulf %51, %34 : vector<8x32xf32>
    %61 = arith.mulf %45, %53 : vector<8x32xf32>
    %62 = arith.addf %60, %61 : vector<8x32xf32>
    %63 = math.tanh %62 : vector<8x32xf32>
    %64 = arith.mulf %59, %63 : vector<8x32xf32>
    %65 = vector.extract_strided_slice %5 {offsets = [16, 0], sizes = [8, 128], strides = [1, 1]} : vector<64x128xf32> to vector<8x128xf32>
    %cst_17 = arith.constant dense<0.000000e+00> : vector<8x128xf32>
    %66 = tpu.matmul %64, %6, %cst_17 {dimension_numbers = #tpu.dot_dimension_numbers<[1], [0], [0], [1], [0, 0, 1, 1], [], []>} : vector<8x32xf32>, vector<32x128xf32>, vector<8x128xf32> -> vector<8x128xf32>
    %67 = arith.addf %65, %66 : vector<8x128xf32>
    %68 = vector.extract_strided_slice %67 {offsets = [0, 0], sizes = [8, 32], strides = [1, 1]} : vector<8x128xf32> to vector<8x32xf32>
    %69 = arith.negf %68 : vector<8x32xf32>
    %70 = math.exp %69 : vector<8x32xf32>
    %cst_18 = arith.constant 1.000000e+00 : f32
    %71 = vector.broadcast %cst_18 : f32 to vector<8x32xf32>
    %72 = arith.addf %71, %70 : vector<8x32xf32>
    %73 = arith.divf %71, %72 : vector<8x32xf32>
    %74 = vector.extract_strided_slice %67 {offsets = [0, 32], sizes = [8, 32], strides = [1, 1]} : vector<8x128xf32> to vector<8x32xf32>
    %75 = arith.negf %74 : vector<8x32xf32>
    %76 = math.exp %75 : vector<8x32xf32>
    %cst_19 = arith.constant 1.000000e+00 : f32
    %77 = vector.broadcast %cst_19 : f32 to vector<8x32xf32>
    %78 = arith.addf %77, %76 : vector<8x32xf32>
    %79 = arith.divf %77, %78 : vector<8x32xf32>
    %80 = vector.extract_strided_slice %67 {offsets = [0, 64], sizes = [8, 32], strides = [1, 1]} : vector<8x128xf32> to vector<8x32xf32>
    %81 = math.tanh %80 : vector<8x32xf32>
    %82 = vector.extract_strided_slice %67 {offsets = [0, 96], sizes = [8, 32], strides = [1, 1]} : vector<8x128xf32> to vector<8x32xf32>
    %83 = arith.negf %82 : vector<8x32xf32>
    %84 = math.exp %83 : vector<8x32xf32>
    %cst_20 = arith.constant 1.000000e+00 : f32
    %85 = vector.broadcast %cst_20 : f32 to vector<8x32xf32>
    %86 = arith.addf %85, %84 : vector<8x32xf32>
    %87 = arith.divf %85, %86 : vector<8x32xf32>
    %88 = arith.mulf %79, %62 : vector<8x32xf32>
    %89 = arith.mulf %73, %81 : vector<8x32xf32>
    %90 = arith.addf %88, %89 : vector<8x32xf32>
    %91 = math.tanh %90 : vector<8x32xf32>
    %92 = arith.mulf %87, %91 : vector<8x32xf32>
    %93 = vector.extract_strided_slice %5 {offsets = [24, 0], sizes = [8, 128], strides = [1, 1]} : vector<64x128xf32> to vector<8x128xf32>
    %cst_21 = arith.constant dense<0.000000e+00> : vector<8x128xf32>
    %94 = tpu.matmul %92, %6, %cst_21 {dimension_numbers = #tpu.dot_dimension_numbers<[1], [0], [0], [1], [0, 0, 1, 1], [], []>} : vector<8x32xf32>, vector<32x128xf32>, vector<8x128xf32> -> vector<8x128xf32>
    %95 = arith.addf %93, %94 : vector<8x128xf32>
    %96 = vector.extract_strided_slice %95 {offsets = [0, 0], sizes = [8, 32], strides = [1, 1]} : vector<8x128xf32> to vector<8x32xf32>
    %97 = arith.negf %96 : vector<8x32xf32>
    %98 = math.exp %97 : vector<8x32xf32>
    %cst_22 = arith.constant 1.000000e+00 : f32
    %99 = vector.broadcast %cst_22 : f32 to vector<8x32xf32>
    %100 = arith.addf %99, %98 : vector<8x32xf32>
    %101 = arith.divf %99, %100 : vector<8x32xf32>
    %102 = vector.extract_strided_slice %95 {offsets = [0, 32], sizes = [8, 32], strides = [1, 1]} : vector<8x128xf32> to vector<8x32xf32>
    %103 = arith.negf %102 : vector<8x32xf32>
    %104 = math.exp %103 : vector<8x32xf32>
    %cst_23 = arith.constant 1.000000e+00 : f32
    %105 = vector.broadcast %cst_23 : f32 to vector<8x32xf32>
    %106 = arith.addf %105, %104 : vector<8x32xf32>
    %107 = arith.divf %105, %106 : vector<8x32xf32>
    %108 = vector.extract_strided_slice %95 {offsets = [0, 64], sizes = [8, 32], strides = [1, 1]} : vector<8x128xf32> to vector<8x32xf32>
    %109 = math.tanh %108 : vector<8x32xf32>
    %110 = vector.extract_strided_slice %95 {offsets = [0, 96], sizes = [8, 32], strides = [1, 1]} : vector<8x128xf32> to vector<8x32xf32>
    %111 = arith.negf %110 : vector<8x32xf32>
    %112 = math.exp %111 : vector<8x32xf32>
    %cst_24 = arith.constant 1.000000e+00 : f32
    %113 = vector.broadcast %cst_24 : f32 to vector<8x32xf32>
    %114 = arith.addf %113, %112 : vector<8x32xf32>
    %115 = arith.divf %113, %114 : vector<8x32xf32>
    %116 = arith.mulf %107, %90 : vector<8x32xf32>
    %117 = arith.mulf %101, %109 : vector<8x32xf32>
    %118 = arith.addf %116, %117 : vector<8x32xf32>
    %119 = math.tanh %118 : vector<8x32xf32>
    %120 = arith.mulf %115, %119 : vector<8x32xf32>
    %121 = vector.extract_strided_slice %5 {offsets = [32, 0], sizes = [8, 128], strides = [1, 1]} : vector<64x128xf32> to vector<8x128xf32>
    %cst_25 = arith.constant dense<0.000000e+00> : vector<8x128xf32>
    %122 = tpu.matmul %120, %6, %cst_25 {dimension_numbers = #tpu.dot_dimension_numbers<[1], [0], [0], [1], [0, 0, 1, 1], [], []>} : vector<8x32xf32>, vector<32x128xf32>, vector<8x128xf32> -> vector<8x128xf32>
    %123 = arith.addf %121, %122 : vector<8x128xf32>
    %124 = vector.extract_strided_slice %123 {offsets = [0, 0], sizes = [8, 32], strides = [1, 1]} : vector<8x128xf32> to vector<8x32xf32>
    %125 = arith.negf %124 : vector<8x32xf32>
    %126 = math.exp %125 : vector<8x32xf32>
    %cst_26 = arith.constant 1.000000e+00 : f32
    %127 = vector.broadcast %cst_26 : f32 to vector<8x32xf32>
    %128 = arith.addf %127, %126 : vector<8x32xf32>
    %129 = arith.divf %127, %128 : vector<8x32xf32>
    %130 = vector.extract_strided_slice %123 {offsets = [0, 32], sizes = [8, 32], strides = [1, 1]} : vector<8x128xf32> to vector<8x32xf32>
    %131 = arith.negf %130 : vector<8x32xf32>
    %132 = math.exp %131 : vector<8x32xf32>
    %cst_27 = arith.constant 1.000000e+00 : f32
    %133 = vector.broadcast %cst_27 : f32 to vector<8x32xf32>
    %134 = arith.addf %133, %132 : vector<8x32xf32>
    %135 = arith.divf %133, %134 : vector<8x32xf32>
    %136 = vector.extract_strided_slice %123 {offsets = [0, 64], sizes = [8, 32], strides = [1, 1]} : vector<8x128xf32> to vector<8x32xf32>
    %137 = math.tanh %136 : vector<8x32xf32>
    %138 = vector.extract_strided_slice %123 {offsets = [0, 96], sizes = [8, 32], strides = [1, 1]} : vector<8x128xf32> to vector<8x32xf32>
    %139 = arith.negf %138 : vector<8x32xf32>
    %140 = math.exp %139 : vector<8x32xf32>
    %cst_28 = arith.constant 1.000000e+00 : f32
    %141 = vector.broadcast %cst_28 : f32 to vector<8x32xf32>
    %142 = arith.addf %141, %140 : vector<8x32xf32>
    %143 = arith.divf %141, %142 : vector<8x32xf32>
    %144 = arith.mulf %135, %118 : vector<8x32xf32>
    %145 = arith.mulf %129, %137 : vector<8x32xf32>
    %146 = arith.addf %144, %145 : vector<8x32xf32>
    %147 = math.tanh %146 : vector<8x32xf32>
    %148 = arith.mulf %143, %147 : vector<8x32xf32>
    %149 = vector.extract_strided_slice %5 {offsets = [40, 0], sizes = [8, 128], strides = [1, 1]} : vector<64x128xf32> to vector<8x128xf32>
    %cst_29 = arith.constant dense<0.000000e+00> : vector<8x128xf32>
    %150 = tpu.matmul %148, %6, %cst_29 {dimension_numbers = #tpu.dot_dimension_numbers<[1], [0], [0], [1], [0, 0, 1, 1], [], []>} : vector<8x32xf32>, vector<32x128xf32>, vector<8x128xf32> -> vector<8x128xf32>
    %151 = arith.addf %149, %150 : vector<8x128xf32>
    %152 = vector.extract_strided_slice %151 {offsets = [0, 0], sizes = [8, 32], strides = [1, 1]} : vector<8x128xf32> to vector<8x32xf32>
    %153 = arith.negf %152 : vector<8x32xf32>
    %154 = math.exp %153 : vector<8x32xf32>
    %cst_30 = arith.constant 1.000000e+00 : f32
    %155 = vector.broadcast %cst_30 : f32 to vector<8x32xf32>
    %156 = arith.addf %155, %154 : vector<8x32xf32>
    %157 = arith.divf %155, %156 : vector<8x32xf32>
    %158 = vector.extract_strided_slice %151 {offsets = [0, 32], sizes = [8, 32], strides = [1, 1]} : vector<8x128xf32> to vector<8x32xf32>
    %159 = arith.negf %158 : vector<8x32xf32>
    %160 = math.exp %159 : vector<8x32xf32>
    %cst_31 = arith.constant 1.000000e+00 : f32
    %161 = vector.broadcast %cst_31 : f32 to vector<8x32xf32>
    %162 = arith.addf %161, %160 : vector<8x32xf32>
    %163 = arith.divf %161, %162 : vector<8x32xf32>
    %164 = vector.extract_strided_slice %151 {offsets = [0, 64], sizes = [8, 32], strides = [1, 1]} : vector<8x128xf32> to vector<8x32xf32>
    %165 = math.tanh %164 : vector<8x32xf32>
    %166 = vector.extract_strided_slice %151 {offsets = [0, 96], sizes = [8, 32], strides = [1, 1]} : vector<8x128xf32> to vector<8x32xf32>
    %167 = arith.negf %166 : vector<8x32xf32>
    %168 = math.exp %167 : vector<8x32xf32>
    %cst_32 = arith.constant 1.000000e+00 : f32
    %169 = vector.broadcast %cst_32 : f32 to vector<8x32xf32>
    %170 = arith.addf %169, %168 : vector<8x32xf32>
    %171 = arith.divf %169, %170 : vector<8x32xf32>
    %172 = arith.mulf %163, %146 : vector<8x32xf32>
    %173 = arith.mulf %157, %165 : vector<8x32xf32>
    %174 = arith.addf %172, %173 : vector<8x32xf32>
    %175 = math.tanh %174 : vector<8x32xf32>
    %176 = arith.mulf %171, %175 : vector<8x32xf32>
    %177 = vector.extract_strided_slice %5 {offsets = [48, 0], sizes = [8, 128], strides = [1, 1]} : vector<64x128xf32> to vector<8x128xf32>
    %cst_33 = arith.constant dense<0.000000e+00> : vector<8x128xf32>
    %178 = tpu.matmul %176, %6, %cst_33 {dimension_numbers = #tpu.dot_dimension_numbers<[1], [0], [0], [1], [0, 0, 1, 1], [], []>} : vector<8x32xf32>, vector<32x128xf32>, vector<8x128xf32> -> vector<8x128xf32>
    %179 = arith.addf %177, %178 : vector<8x128xf32>
    %180 = vector.extract_strided_slice %179 {offsets = [0, 0], sizes = [8, 32], strides = [1, 1]} : vector<8x128xf32> to vector<8x32xf32>
    %181 = arith.negf %180 : vector<8x32xf32>
    %182 = math.exp %181 : vector<8x32xf32>
    %cst_34 = arith.constant 1.000000e+00 : f32
    %183 = vector.broadcast %cst_34 : f32 to vector<8x32xf32>
    %184 = arith.addf %183, %182 : vector<8x32xf32>
    %185 = arith.divf %183, %184 : vector<8x32xf32>
    %186 = vector.extract_strided_slice %179 {offsets = [0, 32], sizes = [8, 32], strides = [1, 1]} : vector<8x128xf32> to vector<8x32xf32>
    %187 = arith.negf %186 : vector<8x32xf32>
    %188 = math.exp %187 : vector<8x32xf32>
    %cst_35 = arith.constant 1.000000e+00 : f32
    %189 = vector.broadcast %cst_35 : f32 to vector<8x32xf32>
    %190 = arith.addf %189, %188 : vector<8x32xf32>
    %191 = arith.divf %189, %190 : vector<8x32xf32>
    %192 = vector.extract_strided_slice %179 {offsets = [0, 64], sizes = [8, 32], strides = [1, 1]} : vector<8x128xf32> to vector<8x32xf32>
    %193 = math.tanh %192 : vector<8x32xf32>
    %194 = vector.extract_strided_slice %179 {offsets = [0, 96], sizes = [8, 32], strides = [1, 1]} : vector<8x128xf32> to vector<8x32xf32>
    %195 = arith.negf %194 : vector<8x32xf32>
    %196 = math.exp %195 : vector<8x32xf32>
    %cst_36 = arith.constant 1.000000e+00 : f32
    %197 = vector.broadcast %cst_36 : f32 to vector<8x32xf32>
    %198 = arith.addf %197, %196 : vector<8x32xf32>
    %199 = arith.divf %197, %198 : vector<8x32xf32>
    %200 = arith.mulf %191, %174 : vector<8x32xf32>
    %201 = arith.mulf %185, %193 : vector<8x32xf32>
    %202 = arith.addf %200, %201 : vector<8x32xf32>
    %203 = math.tanh %202 : vector<8x32xf32>
    %204 = arith.mulf %199, %203 : vector<8x32xf32>
    %205 = vector.extract_strided_slice %5 {offsets = [56, 0], sizes = [8, 128], strides = [1, 1]} : vector<64x128xf32> to vector<8x128xf32>
    %cst_37 = arith.constant dense<0.000000e+00> : vector<8x128xf32>
    %206 = tpu.matmul %204, %6, %cst_37 {dimension_numbers = #tpu.dot_dimension_numbers<[1], [0], [0], [1], [0, 0, 1, 1], [], []>} : vector<8x32xf32>, vector<32x128xf32>, vector<8x128xf32> -> vector<8x128xf32>
    %207 = arith.addf %205, %206 : vector<8x128xf32>
    %208 = vector.extract_strided_slice %207 {offsets = [0, 0], sizes = [8, 32], strides = [1, 1]} : vector<8x128xf32> to vector<8x32xf32>
    %209 = arith.negf %208 : vector<8x32xf32>
    %210 = math.exp %209 : vector<8x32xf32>
    %cst_38 = arith.constant 1.000000e+00 : f32
    %211 = vector.broadcast %cst_38 : f32 to vector<8x32xf32>
    %212 = arith.addf %211, %210 : vector<8x32xf32>
    %213 = arith.divf %211, %212 : vector<8x32xf32>
    %214 = vector.extract_strided_slice %207 {offsets = [0, 32], sizes = [8, 32], strides = [1, 1]} : vector<8x128xf32> to vector<8x32xf32>
    %215 = arith.negf %214 : vector<8x32xf32>
    %216 = math.exp %215 : vector<8x32xf32>
    %cst_39 = arith.constant 1.000000e+00 : f32
    %217 = vector.broadcast %cst_39 : f32 to vector<8x32xf32>
    %218 = arith.addf %217, %216 : vector<8x32xf32>
    %219 = arith.divf %217, %218 : vector<8x32xf32>
    %220 = vector.extract_strided_slice %207 {offsets = [0, 64], sizes = [8, 32], strides = [1, 1]} : vector<8x128xf32> to vector<8x32xf32>
    %221 = math.tanh %220 : vector<8x32xf32>
    %222 = vector.extract_strided_slice %207 {offsets = [0, 96], sizes = [8, 32], strides = [1, 1]} : vector<8x128xf32> to vector<8x32xf32>
    %223 = arith.negf %222 : vector<8x32xf32>
    %224 = math.exp %223 : vector<8x32xf32>
    %cst_40 = arith.constant 1.000000e+00 : f32
    %225 = vector.broadcast %cst_40 : f32 to vector<8x32xf32>
    %226 = arith.addf %225, %224 : vector<8x32xf32>
    %227 = arith.divf %225, %226 : vector<8x32xf32>
    %228 = arith.mulf %219, %202 : vector<8x32xf32>
    %229 = arith.mulf %213, %221 : vector<8x32xf32>
    %230 = arith.addf %228, %229 : vector<8x32xf32>
    %231 = math.tanh %230 : vector<8x32xf32>
    %232 = arith.mulf %227, %231 : vector<8x32xf32>
    %c0_41 = arith.constant 0 : index
    %c0_42 = arith.constant 0 : index
    %233 = vector.load %arg8[%c0_41, %c0_42] : memref<8x32xf32, #tpu.memory_space<vmem>>, vector<8x32xf32>
    tpu.vector_store %arg8[%c0_41, %c0_42], %232 {strides = array<i32>} : memref<8x32xf32, #tpu.memory_space<vmem>>, vector<8x32xf32>,
    %c0_43 = arith.constant 0 : index
    %234 = memref.load %arg1[%c0_43] : memref<8xi32, #tpu.memory_space<smem>>
    %235 = arith.index_cast %234 : i32 to index
    %c0_44 = arith.constant 0 : index
    %236 = vector.load %arg8[%235, %c0_44] : memref<8x32xf32, #tpu.memory_space<vmem>>, vector<1x32xf32>
    %c0_45 = arith.constant 0 : index
    %237 = memref.load %arg2[%c0_45] : memref<8xi32, #tpu.memory_space<smem>>
    %238 = arith.index_cast %237 : i32 to index
    %c0_46 = arith.constant 0 : index
    %239 = vector.load %arg8[%238, %c0_46] : memref<8x32xf32, #tpu.memory_space<vmem>>, vector<1x32xf32>
    %c1 = arith.constant 1 : index
    %240 = memref.load %arg1[%c1] : memref<8xi32, #tpu.memory_space<smem>>
    %241 = arith.index_cast %240 : i32 to index
    %c0_47 = arith.constant 0 : index
    %242 = vector.load %arg8[%241, %c0_47] : memref<8x32xf32, #tpu.memory_space<vmem>>, vector<1x32xf32>
    %c1_48 = arith.constant 1 : index
    %243 = memref.load %arg2[%c1_48] : memref<8xi32, #tpu.memory_space<smem>>
    %244 = arith.index_cast %243 : i32 to index
    %c0_49 = arith.constant 0 : index
    %245 = vector.load %arg8[%244, %c0_49] : memref<8x32xf32, #tpu.memory_space<vmem>>, vector<1x32xf32>
    %c2 = arith.constant 2 : index
    %246 = memref.load %arg1[%c2] : memref<8xi32, #tpu.memory_space<smem>>
    %247 = arith.index_cast %246 : i32 to index
    %c0_50 = arith.constant 0 : index
    %248 = vector.load %arg8[%247, %c0_50] : memref<8x32xf32, #tpu.memory_space<vmem>>, vector<1x32xf32>
    %c2_51 = arith.constant 2 : index
    %249 = memref.load %arg2[%c2_51] : memref<8xi32, #tpu.memory_space<smem>>
    %250 = arith.index_cast %249 : i32 to index
    %c0_52 = arith.constant 0 : index
    %251 = vector.load %arg8[%250, %c0_52] : memref<8x32xf32, #tpu.memory_space<vmem>>, vector<1x32xf32>
    %c3 = arith.constant 3 : index
    %252 = memref.load %arg1[%c3] : memref<8xi32, #tpu.memory_space<smem>>
    %253 = arith.index_cast %252 : i32 to index
    %c0_53 = arith.constant 0 : index
    %254 = vector.load %arg8[%253, %c0_53] : memref<8x32xf32, #tpu.memory_space<vmem>>, vector<1x32xf32>
    %c3_54 = arith.constant 3 : index
    %255 = memref.load %arg2[%c3_54] : memref<8xi32, #tpu.memory_space<smem>>
    %256 = arith.index_cast %255 : i32 to index
    %c0_55 = arith.constant 0 : index
    %257 = vector.load %arg8[%256, %c0_55] : memref<8x32xf32, #tpu.memory_space<vmem>>, vector<1x32xf32>
    %c4 = arith.constant 4 : index
    %258 = memref.load %arg1[%c4] : memref<8xi32, #tpu.memory_space<smem>>
    %259 = arith.index_cast %258 : i32 to index
    %c0_56 = arith.constant 0 : index
    %260 = vector.load %arg8[%259, %c0_56] : memref<8x32xf32, #tpu.memory_space<vmem>>, vector<1x32xf32>
    %c4_57 = arith.constant 4 : index
    %261 = memref.load %arg2[%c4_57] : memref<8xi32, #tpu.memory_space<smem>>
    %262 = arith.index_cast %261 : i32 to index
    %c0_58 = arith.constant 0 : index
    %263 = vector.load %arg8[%262, %c0_58] : memref<8x32xf32, #tpu.memory_space<vmem>>, vector<1x32xf32>
    %c5 = arith.constant 5 : index
    %264 = memref.load %arg1[%c5] : memref<8xi32, #tpu.memory_space<smem>>
    %265 = arith.index_cast %264 : i32 to index
    %c0_59 = arith.constant 0 : index
    %266 = vector.load %arg8[%265, %c0_59] : memref<8x32xf32, #tpu.memory_space<vmem>>, vector<1x32xf32>
    %c5_60 = arith.constant 5 : index
    %267 = memref.load %arg2[%c5_60] : memref<8xi32, #tpu.memory_space<smem>>
    %268 = arith.index_cast %267 : i32 to index
    %c0_61 = arith.constant 0 : index
    %269 = vector.load %arg8[%268, %c0_61] : memref<8x32xf32, #tpu.memory_space<vmem>>, vector<1x32xf32>
    %c6 = arith.constant 6 : index
    %270 = memref.load %arg1[%c6] : memref<8xi32, #tpu.memory_space<smem>>
    %271 = arith.index_cast %270 : i32 to index
    %c0_62 = arith.constant 0 : index
    %272 = vector.load %arg8[%271, %c0_62] : memref<8x32xf32, #tpu.memory_space<vmem>>, vector<1x32xf32>
    %c6_63 = arith.constant 6 : index
    %273 = memref.load %arg2[%c6_63] : memref<8xi32, #tpu.memory_space<smem>>
    %274 = arith.index_cast %273 : i32 to index
    %c0_64 = arith.constant 0 : index
    %275 = vector.load %arg8[%274, %c0_64] : memref<8x32xf32, #tpu.memory_space<vmem>>, vector<1x32xf32>
    %c7 = arith.constant 7 : index
    %276 = memref.load %arg1[%c7] : memref<8xi32, #tpu.memory_space<smem>>
    %277 = arith.index_cast %276 : i32 to index
    %c0_65 = arith.constant 0 : index
    %278 = vector.load %arg8[%277, %c0_65] : memref<8x32xf32, #tpu.memory_space<vmem>>, vector<1x32xf32>
    %c7_66 = arith.constant 7 : index
    %279 = memref.load %arg2[%c7_66] : memref<8xi32, #tpu.memory_space<smem>>
    %280 = arith.index_cast %279 : i32 to index
    %c0_67 = arith.constant 0 : index
    %281 = vector.load %arg8[%280, %c0_67] : memref<8x32xf32, #tpu.memory_space<vmem>>, vector<1x32xf32>
    %282 = tpu.concatenate %236, %242, %248, %254, %260, %266, %272, %278 in 0 : vector<1x32xf32>, vector<1x32xf32>, vector<1x32xf32>, vector<1x32xf32>, vector<1x32xf32>, vector<1x32xf32>, vector<1x32xf32>, vector<1x32xf32> -> vector<8x32xf32>
    %283 = tpu.concatenate %239, %245, %251, %257, %263, %269, %275, %281 in 0 : vector<1x32xf32>, vector<1x32xf32>, vector<1x32xf32>, vector<1x32xf32>, vector<1x32xf32>, vector<1x32xf32>, vector<1x32xf32>, vector<1x32xf32> -> vector<8x32xf32>
    %284 = arith.mulf %282, %283 : vector<8x32xf32>
    %cst_68 = arith.constant dense<0.000000e+00> : vector<8xf32>
    %285 = vector.multi_reduction <add>, %284, %cst_68 [1] : vector<8x32xf32> to vector<8xf32>
    %286 = vector.shape_cast %285 : vector<8xf32> to vector<8x1xf32>
    %287 = arith.negf %286 : vector<8x1xf32>
    %288 = math.exp %287 : vector<8x1xf32>
    %cst_69 = arith.constant 1.000000e+00 : f32
    %289 = vector.broadcast %cst_69 : f32 to vector<8x1xf32>
    %290 = arith.addf %289, %288 : vector<8x1xf32>
    %291 = arith.divf %289, %290 : vector<8x1xf32>
    %c0_70 = arith.constant 0 : index
    %c0_71 = arith.constant 0 : index
    %292 = vector.load %arg7[%c0_70, %c0_71] : memref<8x1xf32, #tpu.memory_space<vmem>>, vector<8x1xf32>
    tpu.vector_store %arg7[%c0_70, %c0_71], %291 {strides = array<i32>} : memref<8x1xf32, #tpu.memory_space<vmem>>, vector<8x1xf32>,
    return
  }
  func.func @transform_0(%arg0: i32, %arg1: memref<8xi32, #tpu.memory_space<smem>>, %arg2: memref<8xi32, #tpu.memory_space<smem>>) -> (i32, i32) {
    %c0_i32 = arith.constant 0 : i32
    %c0_i32_0 = arith.constant 0 : i32
    %c0_i32_1 = arith.constant 0 : i32
    return %c0_i32, %c0_i32_0 : i32, i32
  }
  func.func @transform_1(%arg0: i32, %arg1: memref<8xi32, #tpu.memory_space<smem>>, %arg2: memref<8xi32, #tpu.memory_space<smem>>) -> (i32, i32) {
    %c0_i32 = arith.constant 0 : i32
    %c0_i32_0 = arith.constant 0 : i32
    %c0_i32_1 = arith.constant 0 : i32
    return %c0_i32, %c0_i32_0 : i32, i32
  }
  func.func @transform_2(%arg0: i32, %arg1: memref<8xi32, #tpu.memory_space<smem>>, %arg2: memref<8xi32, #tpu.memory_space<smem>>) -> (i32, i32) {
    %c0_i32 = arith.constant 0 : i32
    %c0_i32_0 = arith.constant 0 : i32
    %c0_i32_1 = arith.constant 0 : i32
    return %c0_i32, %c0_i32_0 : i32, i32
  }
  func.func @transform_3(%arg0: i32, %arg1: memref<8xi32, #tpu.memory_space<smem>>, %arg2: memref<8xi32, #tpu.memory_space<smem>>) -> (i32, i32) {
    %c0_i32 = arith.constant 0 : i32
    %c0_i32_0 = arith.constant 0 : i32
    %c0_i32_1 = arith.constant 0 : i32
    return %c0_i32, %c0_i32_0 : i32, i32
  }
  func.func @transform_4(%arg0: i32, %arg1: memref<8xi32, #tpu.memory_space<smem>>, %arg2: memref<8xi32, #tpu.memory_space<smem>>) -> (i32, i32) {
    %c0_i32 = arith.constant 0 : i32
    %c0_i32_0 = arith.constant 0 : i32
    %c0_i32_1 = arith.constant 0 : i32
    return %c0_i32, %c0_i32_0 : i32, i32
  }
}

</mosaic_0001>

<bundles_post_ra>
// kernel: tpu_custom_call.1
= control target key start
LH: loop header
LB: loop body
LE: loop exit
PB: predicated region body
PF: predicated region fallthrough
CT: control target
= control target key end

     0   :  { %s1722_s0 = inlined_call_operand.vmem [shape: s32[8], index: 0, kind: input, shape index: {}]   ;;  %s1723_s2 = inlined_call_operand.vmem [shape: f32[64,16], index: 2, kind: input, shape index: {}]   ;;  %s1724_s3 = inlined_call_operand.vmem [shape: f32[16,128], index: 3, kind: input, shape index: {}]   ;;  %s1725_s4 = inlined_call_operand.vmem [shape: f32[32,128], index: 4, kind: input, shape index: {}]   ;;  %s1726_s5 = inlined_call_operand.vmem [shape: f32[1,128], index: 5, kind: input, shape index: {}]   ;;  %s1727_s6 = inlined_call_operand.vmem [shape: f32[8,1], index: 6, kind: output, shape index: {}]   ;;  %s1728_s1 = inlined_call_operand.vmem [shape: s32[8], index: 1, kind: input, shape index: {}]  }
   0x1   :  { %s11_s23 = sshll.u32 %s1722_s0, 4  ;;  %s15_s26 = sshll.u32 %s1728_s1, 4  ;;  %s12_s23 = int_to_ptr.vmem [resolvable:$true] %s11_s23  ;;  %s16_s26 = int_to_ptr.vmem [resolvable:$true] %s15_s26 }
   0x2   :  { %s1394_s27 = scalar_lea.vmem %s12_s23, 16  ;;  %p1399_p1 = scmp.lt.s32.totalorder %s12_s23, %s12_s23 }
   0x3   :  { %p1395_p0 = scmp.ne.s32.totalorder %s12_s23, %s1394_s27  ;;  %p1400_p2 = scmp.lt.s32.totalorder %s1394_s27, %s1394_s27 }
   0x5   :  { %p1401_p3 = por %p1400_p2, %p1399_p1 }
   0x7   :  { %p1402_p4 = pnand %p1401_p3, %p1395_p0 }
   0x9   :  { %1405 = shalt.err (!%p1402_p4)  }
   0xa   :  { %s1420_s28 = smov [#allocation4]   ;;  %s1406_s29 = scalar_lea.vmem %s16_s26, 16 }
   0xb   :  { %14 = dma.vmem_to_smem %s12_s23, 16, %s1420_s28, [#allocation3] }
   0xc   :  { %p1407_p5 = scmp.ne.s32.totalorder %s16_s26, %s1406_s29  ;;  %p1411_p6 = scmp.lt.s32.totalorder %s16_s26, %s16_s26 }
   0xd   :  { %p1412_p7 = scmp.lt.s32.totalorder %s1406_s29, %s1406_s29 }
   0xf   :  { %p1413_p8 = por %p1412_p7, %p1411_p6 }
  0x11   :  { %p1414_p9 = pnand %p1413_p8, %p1407_p5 }
  0x13   :  { %1417 = shalt.err (!%p1414_p9)  }
  0x14   :  { %s1421_s0 = smov [#allocation5]  }
  0x15   :  { %18 = dma.vmem_to_smem %s16_s26, 16, %s1421_s0, [#allocation3] }
  0x16   :  { %1418 = dma.done.wait [#allocation3], 32 }
  0x17   :  { %1419 = vsyncadd [#allocation3], 4294967264 }
  0x18   :  { %20 = sfence }
  0x19   :  { %v38_v0 = vld [vmem:[%s1724_s3 + $0x8] sm:$0xff]  ;;  %v1473_v1 = vld [vmem:[%s1725_s4 + $0x18] sm:$0xff]  ;;  %v37_v2 = vld [vmem:[%s1724_s3] sm:$0xff]  ;;  %v1422_v3 = vmov 0.0   ;;  %vm46_vm0 = vcmask 130048   ;;  %vm1423_vm1 = vmmov 0  }
  0x1a   :  { %1216 = vmatprep.subr.mxu0 %v38_v0  ;;  %1232 = vmatprep.subr.mxu1 %v1422_v3  ;;  %v29_v4 = vld [vmem:[%s1723_s2] sm:$0xff]  ;;  %v1486_v5 = vld [vmem:[%s1725_s4 + $0x10] sm:$0xff]  ;;  %v30_v6 = vld [vmem:[%s1723_s2 + $0x8] sm:$0xff]  ;;  %s1424_s21 = smov 64   ;;  %vm180_vm2 = vcmask 261120   ;;  %s1672_s8 = sld [smem:[#allocation5]] }
  0x1b   :  { %1217 = vmatpush3.msra.mxu0 %v38_v0  ;;  %1233 = vmatpush3.msra.mxu1 %v1473_v1  ;;  %v1496_v7 = vld [vmem:[%s1725_s4 + $0x8] sm:$0xff]  ;;  %v1504_v8 = vld [vmem:[%s1725_s4] sm:$0xff]  ;;  %v31_v44 = vld [vmem:[%s1723_s2 + $0x10] sm:$0xff]  ;;  %s1151_s9 = sld [smem:[#allocation4 + $0x1]]  ;;  %vm1053_vm3 = vcmask 1040384   ;;  %vm1055_vm4 = vcmask 1041408  }
  0x1c   :  { %1218 = vmatprep.subr.mxu0 %v37_v2  ;;  %1234 = vmatprep.subr.mxu1 %v1422_v3  ;;  %v1535_v10 = vld [vmem:[%s1726_s5] ss:$0 sm:$0xff]  ;;  %s1425_s5 = smov 32   ;;  %v32_v45 = vld [vmem:[%s1723_s2 + $0x18] sm:$0xff]  ;;  %v34_v47 = vld [vmem:[%s1723_s2 + $0x28] sm:$0xff]  ;;  %s1152_s10 = sld [smem:[#allocation5 + $0x1]] }
  0x1d   :  { %1219 = vmatpush3.msra.mxu0 %v37_v2  ;;  %1220 = vmatprep.mubr.msk.f32.mxu0 %vm46_vm0, %v29_v4  ;;  %v33_v46 = vld [vmem:[%s1723_s2 + $0x20] sm:$0xff]  ;;  %v35_v48 = vld [vmem:[%s1723_s2 + $0x30] sm:$0xff]  ;;  %v36_v49 = vld [vmem:[%s1723_s2 + $0x38] sm:$0xff]  ;;  %s1670_s2 = sld [smem:[#allocation4]]  ;;  %vm1057_vm5 = vcmask 1042432   ;;  %vm1059_vm6 = vcmask 1043456  }
  0x1e   :  { %1235 = vmatpush3.msra.mxu1 %v1486_v5  ;;  %1221 = vmatmul.mubr.msk.f32.vlgmr.msra.gmra.mxu0 %vm46_vm0, %v30_v6  ;;  %s1153_s11 = sld [smem:[#allocation4 + $0x2]]  ;;  %vm1061_vm7 = vcmask 1044480   ;;  %vm1063_vm8 = vcmask 1045504   ;;  %vm1065_vm9 = vcmask 1046528   ;;  %vm1105_vm10 = vcmask 7168  }
  0x1f   :  { %1236 = vmatprep.subr.mxu1 %v1422_v3  ;;  %1240 = vmatprep.mubr.msk.f32.mxu1 %vm1423_vm1, %v1422_v3  ;;  %s1154_s12 = sld [smem:[#allocation5 + $0x2]] }
  0x20   :  { %1237 = vmatpush3.msra.mxu1 %v1496_v7  ;;  %1254 = vmatprep.subr.mxu0 %v1422_v3  ;;  %s1155_s13 = sld [smem:[#allocation4 + $0x3]]  ;;  %s988_s27 = scalar_lea.vmem [#allocation2], %s1672_s8 }
  0x21   :  { %1238 = vmatprep.subr.mxu1 %v1422_v3  ;;  %1255 = vmatpush3.msra.mxu0 %v1473_v1  ;;  %s1674_s14 = sld [smem:[#allocation5 + $0x3]] }
  0x22   :  { %1239 = vmatpush3.msra.mxu1 %v1504_v8  ;;  %1256 = vmatprep.subr.mxu0 %v1422_v3  ;;  %s1676_s15 = sld [smem:[#allocation4 + $0x4]]  ;;  %s994_s22 = scalar_lea.vmem [#allocation2], %s1152_s10 }
  0x23   :  { %1241 = vmatmul.mubr.f32.vlgmr.msra.gmra.mxu1 %v1422_v3  ;;  %1243 = vmatprep.subr.mxu1 %v1422_v3  ;;  %s1678_s16 = sld [smem:[#allocation5 + $0x4]]  ;;  %s985_s25 = scalar_lea.vmem [#allocation2], %s1670_s2 }
  0x24   :  { %1244 = vmatpush3.msra.mxu1 %v1473_v1  ;;  %1251 = vmatprep.mubr.msk.f32.mxu1 %vm1423_vm1, %v1422_v3  ;;  %s1680_s3 = sld [smem:[#allocation4 + $0x5]] }
  0x25   :  { %1245 = vmatprep.subr.mxu1 %v1422_v3  ;;  %1257 = vmatpush3.msra.mxu0 %v1486_v5  ;;  %s1683_s17 = sld [smem:[#allocation5 + $0x5]]  ;;  %s1000_s23 = scalar_lea.vmem [#allocation2], %s1154_s12 }
  0x26   :  { %1246 = vmatpush3.msra.mxu1 %v1486_v5  ;;  %1258 = vmatprep.subr.mxu0 %v1422_v3  ;;  %s1685_s18 = sld [smem:[#allocation4 + $0x6]]  ;;  %s1003_s24 = scalar_lea.vmem [#allocation2], %s1155_s13 }
  0x27   :  { %1247 = vmatprep.subr.mxu1 %v1422_v3  ;;  %1259 = vmatpush3.msra.mxu0 %v1496_v7  ;;  %s1687_s19 = sld [smem:[#allocation5 + $0x6]]  ;;  %s1006_s28 = scalar_lea.vmem [#allocation2], %s1674_s14 }
  0x28   :  { %1248 = vmatpush3.msra.mxu1 %v1496_v7  ;;  %1260 = vmatprep.subr.mxu0 %v1422_v3  ;;  %s1689_s4 = sld [smem:[#allocation4 + $0x7]]  ;;  %s1009_s26 = scalar_lea.vmem [#allocation2], %s1676_s15 }
  0x29   :  { %1249 = vmatprep.subr.mxu1 %v1422_v3  ;;  %1261 = vmatpush3.msra.mxu0 %v1504_v8  ;;  %s1691_s20 = sld [smem:[#allocation5 + $0x7]]  ;;  %s1012_s0 = scalar_lea.vmem [#allocation2], %s1678_s16 }
  0x2a   :  { %1250 = vmatpush3.msra.mxu1 %v1504_v8  ;;  %1276 = vmatprep.subr.mxu0 %v1422_v3  ;;  %s1015_s29 = scalar_lea.vmem [#allocation2], %s1680_s3 }
  0x2b   :  { %1265 = vmatprep.subr.mxu1 %v1422_v3  ;;  %1223 = vmatprep.mubr.msk.f32.mxu0 %vm46_vm0, %v31_v44  ;;  %s1018_s30 = scalar_lea.vmem [#allocation2], %s1683_s17 }
  0x2c   :  { %1224 = vmatmul.mubr.msk.f32.gmra.mxu0 %vm46_vm0, %v32_v45  ;;  %s1021_s1 = scalar_lea.vmem [#allocation2], %s1685_s18 }
  0x2d   :  { %1226 = vmatprep.mubr.msk.f32.mxu0 %vm46_vm0, %v33_v46  ;;  %s1024_s2 = scalar_lea.vmem [#allocation2], %s1687_s19 }
  0x2e   :  { %s1027_s7 = scalar_lea.vmem [#allocation2], %s1689_s4 }
  0x2f   :  { %s1030_s8 = scalar_lea.vmem [#allocation2], %s1691_s20 }
  0x30   :  { %1227 = vmatmul.mubr.msk.f32.gmra.mxu0 %vm46_vm0, %v34_v47 }
  0x31   :  { %1229 = vmatprep.mubr.msk.f32.mxu0 %vm46_vm0, %v35_v48 }
  0x34   :  { %1230 = vmatmul.mubr.msk.f32.gmra.mxu0 %vm46_vm0, %v36_v49 }
  0x35   :  { %1262 = vmatprep.mubr.msk.f32.mxu0 %vm1423_vm1, %v1422_v3 }
  0xde   :  { %v1222_v9 = vpop.f32.mrf.mxu0 }
  0xdf   :  { %v143_v30 = vadd.f32 %v1222_v9, %v1535_v10 }
  0xe0   :  { %v137_v11 = vpop.f32.mrf.mxu0 }
  0xe1   :  { %v138_v12 = vadd.f32 %v1535_v10, %v137_v11 }
  0xe3   :  { %v250_v13 = vpop.f32.mrf.mxu1 }
  0xe4   :  { %v254_v14 = vadd.f32 %v250_v13, %v138_v12 }
  0xe5   :  { %v1242_v15 = vpop.f32.mrf.mxu1 }
  0xe6   :  { %1326 = vtanh.f32 %v254_v14  ;;  %v1136_v17 = vmul.f32 -1.442695, %v254_v14 }
  0xe8   :  { %1328 = vpow2.f32 %v1136_v17 }
  0xec   :  { %v1225_v54 = vpop.f32.mrf.mxu0 }
  0xee   :  { %v147_v55 = vpop.f32.mrf.mxu0 }
  0xef   :  { %v148_v60 = vadd.f32 %v1535_v10, %v147_v55 }
  0xf0   :  { %v1595_v56 = vpop.f32.mrf.mxu0 }
  0xf2   :  { %v1597_v57 = vpop.f32.mrf.mxu0 }
  0xf3   :  { %v1327_v16 = vpop.eup %1326 }
  0xf4   :  { %264 = vrot.lane.b32.xlu0 %v1327_v16, %s1424_s21  ;;  %v1599_v58 = vpop.f32.mrf.mxu0 }
  0xf5   :  { %v1329_v18 = vpop.eup %1328 }
  0xf6   :  { %v258_v19 = vadd.f32 1.0, %v1329_v18  ;;  %v1601_v59 = vpop.f32.mrf.mxu0 }
  0xf8   :  { %1330 = vrcp.f32 %v258_v19 }
 0x105   :  { %v1331_v20 = vpop.eup %1330 }
 0x106   :  { %v262_v23 = vmul.f32 0.0, %v1331_v20 }
 0x166   :  { %v265_v21 = vpop.permute.xlu0 %264 }
 0x167   :  { %v267_v22 = vmul.f32 %v1331_v20, %v265_v21 }
 0x169   :  { %269 = vrot.lane.b32.xlu0 %v267_v22, %s1425_s5 }
 0x1db   :  { %v270_v24 = vpop.permute.xlu0 %269 }
 0x1dc   :  { %v272_v25 = vadd.f32 %v270_v24, %v262_v23 }
 0x1de   :  { %1332 = vtanh.f32 %v272_v25 }
 0x1eb   :  { %v1333_v26 = vpop.eup %1332 }
 0x1ec   :  { %275 = vrot.lane.b32.xlu1 %v1333_v26, %s1424_s21 }
 0x25e   :  { %v276_v27 = vpop.permute.xlu1 %275 }
 0x25f   :  { %v278_v28 = vmul.f32 %v1331_v20, %v276_v27  ;;  %v153_v20 = vadd.f32 %v1225_v54, %v1535_v10 }
 0x261   :  { %280 = vrot.lane.b32.xlu1 %v278_v28, %s1425_s5 }
 0x2d3   :  { %v281_v29 = vpop.permute.xlu1 %280 }
 0x2d4   :  { %1252 = vmatmul.mubr.msk.f32.vlgmr.msra.gmra.mxu1 %vm180_vm2, %v281_v29 }
 0x2d5   :  { %1266 = vmatpush3.msra.mxu1 %v1473_v1  ;;  %1273 = vmatprep.mubr.msk.f32.mxu1 %vm1423_vm1, %v1422_v3 }
 0x2d6   :  { %1267 = vmatprep.subr.mxu1 %v1422_v3 }
 0x2d7   :  { %1268 = vmatpush3.msra.mxu1 %v1486_v5 }
 0x2d8   :  { %1269 = vmatprep.subr.mxu1 %v1422_v3 }
 0x2d9   :  { %1270 = vmatpush3.msra.mxu1 %v1496_v7 }
 0x2da   :  { %1271 = vmatprep.subr.mxu1 %v1422_v3 }
 0x2db   :  { %1272 = vmatpush3.msra.mxu1 %v1504_v8 }
 0x2dc   :  { %1287 = vmatprep.subr.mxu1 %v1422_v3 }
 0x394   :  { %v350_v31 = vpop.f32.mrf.mxu1 }
 0x395   :  { %v354_v32 = vadd.f32 %v350_v31, %v143_v30 }
 0x396   :  { %v1253_v33 = vpop.f32.mrf.mxu1 }
 0x397   :  { %1334 = vtanh.f32 %v354_v32  ;;  %v1138_v35 = vmul.f32 -1.442695, %v354_v32 }
 0x399   :  { %1336 = vpow2.f32 %v1138_v35 }
 0x3a4   :  { %v1335_v34 = vpop.eup %1334 }
 0x3a5   :  { %364 = vrot.lane.b32.xlu0 %v1335_v34, %s1424_s21 }
 0x3a6   :  { %v1337_v36 = vpop.eup %1336 }
 0x3a7   :  { %v358_v37 = vadd.f32 1.0, %v1337_v36 }
 0x3a9   :  { %1338 = vrcp.f32 %v358_v37 }
 0x3b6   :  { %v1339_v38 = vpop.eup %1338 }
 0x3b7   :  { %v362_v41 = vmul.f32 %v1339_v38, %v272_v25 }
 0x417   :  { %v365_v39 = vpop.permute.xlu0 %364 }
 0x418   :  { %v367_v40 = vmul.f32 %v1339_v38, %v365_v39 }
 0x41a   :  { %369 = vrot.lane.b32.xlu1 %v367_v40, %s1425_s5 }
 0x48c   :  { %v370_v42 = vpop.permute.xlu1 %369 }
 0x48d   :  { %v372_v43 = vadd.f32 %v370_v42, %v362_v41 }
 0x48f   :  { %1340 = vtanh.f32 %v372_v43 }
 0x49c   :  { %v1341_v50 = vpop.eup %1340 }
 0x49d   :  { %375 = vrot.lane.b32.xlu0 %v1341_v50, %s1424_s21 }
 0x50f   :  { %v376_v51 = vpop.permute.xlu0 %375 }
 0x510   :  { %v378_v52 = vmul.f32 %v1339_v38, %v376_v51  ;;  %v158_v38 = vadd.f32 %v1535_v10, %v1597_v57  ;;  %v163_v57 = vadd.f32 %v1595_v56, %v1535_v10 }
 0x512   :  { %380 = vrot.lane.b32.xlu1 %v378_v52, %s1425_s5 }
 0x584   :  { %v381_v53 = vpop.permute.xlu1 %380 }
 0x585   :  { %1263 = vmatmul.mubr.msk.f32.vlgmr.msra.gmra.mxu0 %vm180_vm2, %v381_v53 }
 0x586   :  { %1277 = vmatpush3.msra.mxu0 %v1473_v1  ;;  %1284 = vmatprep.mubr.msk.f32.mxu0 %vm1423_vm1, %v1422_v3 }
 0x587   :  { %1278 = vmatprep.subr.mxu0 %v1422_v3 }
 0x588   :  { %1279 = vmatpush3.msra.mxu0 %v1486_v5 }
 0x589   :  { %1280 = vmatprep.subr.mxu0 %v1422_v3 }
 0x58a   :  { %1281 = vmatpush3.msra.mxu0 %v1496_v7 }
 0x58b   :  { %1282 = vmatprep.subr.mxu0 %v1422_v3 }
 0x58c   :  { %1283 = vmatpush3.msra.mxu0 %v1504_v8 }
 0x58d   :  { %1298 = vmatprep.subr.mxu0 %v1422_v3 }
 0x645   :  { %v450_v61 = vpop.f32.mrf.mxu0 }
 0x646   :  { %v454_v62 = vadd.f32 %v450_v61, %v148_v60 }
 0x647   :  { %v1264_v63 = vpop.f32.mrf.mxu0 }
 0x648   :  { %1342 = vtanh.f32 %v454_v62  ;;  %v1140_v2 = vmul.f32 -1.442695, %v454_v62 }
 0x64a   :  { %1344 = vpow2.f32 %v1140_v2 }
 0x655   :  { %v1343_v0 = vpop.eup %1342 }
 0x656   :  { %464 = vrot.lane.b32.xlu0 %v1343_v0, %s1424_s21 }
 0x657   :  { %v1345_v4 = vpop.eup %1344 }
 0x658   :  { %v458_v6 = vadd.f32 1.0, %v1345_v4 }
 0x65a   :  { %1346 = vrcp.f32 %v458_v6 }
 0x667   :  { %v1347_v9 = vpop.eup %1346 }
 0x668   :  { %v462_v13 = vmul.f32 %v1347_v9, %v372_v43 }
 0x6c8   :  { %v465_v11 = vpop.permute.xlu0 %464 }
 0x6c9   :  { %v467_v12 = vmul.f32 %v1347_v9, %v465_v11 }
 0x6cb   :  { %469 = vrot.lane.b32.xlu1 %v467_v12, %s1425_s5 }
 0x73d   :  { %v470_v14 = vpop.permute.xlu1 %469 }
 0x73e   :  { %v472_v15 = vadd.f32 %v470_v14, %v462_v13  ;;  %v168_v13 = vadd.f32 %v1535_v10, %v1601_v59 }
 0x740   :  { %1348 = vtanh.f32 %v472_v15 }
 0x74d   :  { %v1349_v16 = vpop.eup %1348 }
 0x74e   :  { %475 = vrot.lane.b32.xlu0 %v1349_v16, %s1424_s21 }
 0x7c0   :  { %v476_v17 = vpop.permute.xlu0 %475 }
 0x7c1   :  { %v478_v18 = vmul.f32 %v1347_v9, %v476_v17 }
 0x7c3   :  { %480 = vrot.lane.b32.xlu1 %v478_v18, %s1425_s5 }
 0x835   :  { %v481_v19 = vpop.permute.xlu1 %480 }
 0x836   :  { %1274 = vmatmul.mubr.msk.f32.vlgmr.msra.gmra.mxu1 %vm180_vm2, %v481_v19 }
 0x837   :  { %1288 = vmatpush3.msra.mxu1 %v1473_v1  ;;  %1295 = vmatprep.mubr.msk.f32.mxu1 %vm1423_vm1, %v1422_v3 }
 0x838   :  { %1289 = vmatprep.subr.mxu1 %v1422_v3 }
 0x839   :  { %1290 = vmatpush3.msra.mxu1 %v1486_v5 }
 0x83a   :  { %1291 = vmatprep.subr.mxu1 %v1422_v3 }
 0x83b   :  { %1292 = vmatpush3.msra.mxu1 %v1496_v7 }
 0x83c   :  { %1293 = vmatprep.subr.mxu1 %v1422_v3 }
 0x83d   :  { %1294 = vmatpush3.msra.mxu1 %v1504_v8 }
 0x83e   :  { %1309 = vmatprep.subr.mxu1 %v1422_v3 }
 0x8f6   :  { %v550_v21 = vpop.f32.mrf.mxu1 }
 0x8f7   :  { %v554_v22 = vadd.f32 %v550_v21, %v153_v20 }
 0x8f8   :  { %v1275_v23 = vpop.f32.mrf.mxu1 }
 0x8f9   :  { %1350 = vtanh.f32 %v554_v22  ;;  %v1142_v25 = vmul.f32 -1.442695, %v554_v22 }
 0x8fb   :  { %1352 = vpow2.f32 %v1142_v25 }
 0x906   :  { %v1351_v24 = vpop.eup %1350 }
 0x907   :  { %564 = vrot.lane.b32.xlu0 %v1351_v24, %s1424_s21 }
 0x908   :  { %v1353_v26 = vpop.eup %1352 }
 0x909   :  { %v558_v27 = vadd.f32 1.0, %v1353_v26 }
 0x90b   :  { %1354 = vrcp.f32 %v558_v27 }
 0x918   :  { %v1355_v28 = vpop.eup %1354 }
 0x919   :  { %v562_v31 = vmul.f32 %v1355_v28, %v472_v15 }
 0x979   :  { %v565_v29 = vpop.permute.xlu0 %564 }
 0x97a   :  { %v567_v30 = vmul.f32 %v1355_v28, %v565_v29 }
 0x97c   :  { %569 = vrot.lane.b32.xlu1 %v567_v30, %s1425_s5  ;;  %v173_v30 = vadd.f32 %v1599_v58, %v1535_v10 }
 0x9ee   :  { %v570_v32 = vpop.permute.xlu1 %569 }
 0x9ef   :  { %v572_v33 = vadd.f32 %v570_v32, %v562_v31 }
 0x9f1   :  { %1356 = vtanh.f32 %v572_v33 }
 0x9fe   :  { %v1357_v34 = vpop.eup %1356 }
 0x9ff   :  { %575 = vrot.lane.b32.xlu0 %v1357_v34, %s1424_s21 }
 0xa71   :  { %v576_v35 = vpop.permute.xlu0 %575 }
 0xa72   :  { %v578_v36 = vmul.f32 %v1355_v28, %v576_v35 }
 0xa74   :  { %580 = vrot.lane.b32.xlu1 %v578_v36, %s1425_s5 }
 0xae6   :  { %v581_v37 = vpop.permute.xlu1 %580 }
 0xae7   :  { %1285 = vmatmul.mubr.msk.f32.vlgmr.msra.gmra.mxu0 %vm180_vm2, %v581_v37 }
 0xae8   :  { %1299 = vmatpush3.msra.mxu0 %v1473_v1  ;;  %1306 = vmatprep.mubr.msk.f32.mxu0 %vm1423_vm1, %v1422_v3 }
 0xae9   :  { %1300 = vmatprep.subr.mxu0 %v1422_v3 }
 0xaea   :  { %1301 = vmatpush3.msra.mxu0 %v1486_v5 }
 0xaeb   :  { %1302 = vmatprep.subr.mxu0 %v1422_v3 }
 0xaec   :  { %1303 = vmatpush3.msra.mxu0 %v1496_v7 }
 0xaed   :  { %1304 = vmatprep.subr.mxu0 %v1422_v3 }
 0xaee   :  { %1305 = vmatpush3.msra.mxu0 %v1504_v8 }
 0xba7   :  { %v650_v39 = vpop.f32.mrf.mxu0 }
 0xba8   :  { %v654_v40 = vadd.f32 %v650_v39, %v158_v38 }
 0xba9   :  { %v1286_v41 = vpop.f32.mrf.mxu0 }
 0xbaa   :  { %1358 = vtanh.f32 %v654_v40  ;;  %v1144_v43 = vmul.f32 -1.442695, %v654_v40 }
 0xbac   :  { %1360 = vpow2.f32 %v1144_v43 }
 0xbb7   :  { %v1359_v42 = vpop.eup %1358 }
 0xbb8   :  { %664 = vrot.lane.b32.xlu0 %v1359_v42, %s1424_s21 }
 0xbb9   :  { %v1361_v44 = vpop.eup %1360 }
 0xbba   :  { %v658_v45 = vadd.f32 1.0, %v1361_v44 }
 0xbbc   :  { %1362 = vrcp.f32 %v658_v45 }
 0xbc9   :  { %v1363_v46 = vpop.eup %1362 }
 0xbca   :  { %v662_v49 = vmul.f32 %v1363_v46, %v572_v33 }
 0xc2a   :  { %v665_v47 = vpop.permute.xlu0 %664 }
 0xc2b   :  { %v667_v48 = vmul.f32 %v1363_v46, %v665_v47 }
 0xc2d   :  { %669 = vrot.lane.b32.xlu1 %v667_v48, %s1425_s5 }
 0xc9f   :  { %v670_v50 = vpop.permute.xlu1 %669 }
 0xca0   :  { %v672_v51 = vadd.f32 %v670_v50, %v662_v49 }
 0xca2   :  { %1364 = vtanh.f32 %v672_v51 }
 0xcaf   :  { %v1365_v52 = vpop.eup %1364 }
 0xcb0   :  { %675 = vrot.lane.b32.xlu0 %v1365_v52, %s1424_s21 }
 0xd22   :  { %v676_v53 = vpop.permute.xlu0 %675 }
 0xd23   :  { %v678_v54 = vmul.f32 %v1363_v46, %v676_v53 }
 0xd25   :  { %680 = vrot.lane.b32.xlu1 %v678_v54, %s1425_s5 }
 0xd97   :  { %v681_v55 = vpop.permute.xlu1 %680 }
 0xd98   :  { %1296 = vmatmul.mubr.msk.f32.vlgmr.msra.gmra.mxu1 %vm180_vm2, %v681_v55 }
 0xd99   :  { %1310 = vmatpush3.msra.mxu1 %v1473_v1  ;;  %1317 = vmatprep.mubr.msk.f32.mxu1 %vm1423_vm1, %v1422_v3 }
 0xd9a   :  { %1311 = vmatprep.subr.mxu1 %v1422_v3 }
 0xd9b   :  { %1312 = vmatpush3.msra.mxu1 %v1486_v5 }
 0xd9c   :  { %1313 = vmatprep.subr.mxu1 %v1422_v3 }
 0xd9d   :  { %1314 = vmatpush3.msra.mxu1 %v1496_v7 }
 0xd9e   :  { %1315 = vmatprep.subr.mxu1 %v1422_v3 }
 0xd9f   :  { %1316 = vmatpush3.msra.mxu1 %v1504_v8 }
 0xe58   :  { %v750_v60 = vpop.f32.mrf.mxu1 }
 0xe59   :  { %v754_v1 = vadd.f32 %v750_v60, %v163_v57 }
 0xe5a   :  { %v1297_v61 = vpop.f32.mrf.mxu1 }
 0xe5b   :  { %1366 = vtanh.f32 %v754_v1  ;;  %v1146_v63 = vmul.f32 -1.442695, %v754_v1 }
 0xe5d   :  { %1368 = vpow2.f32 %v1146_v63 }
 0xe68   :  { %v1367_v62 = vpop.eup %1366 }
 0xe69   :  { %764 = vrot.lane.b32.xlu0 %v1367_v62, %s1424_s21 }
 0xe6a   :  { %v1369_v5 = vpop.eup %1368 }
 0xe6b   :  { %v758_v0 = vadd.f32 1.0, %v1369_v5 }
 0xe6d   :  { %1370 = vrcp.f32 %v758_v0 }
 0xe7a   :  { %v1371_v7 = vpop.eup %1370 }
 0xe7b   :  { %v762_v8 = vmul.f32 %v1371_v7, %v672_v51 }
 0xedb   :  { %v765_v2 = vpop.permute.xlu0 %764 }
 0xedc   :  { %v767_v3 = vmul.f32 %v1371_v7, %v765_v2 }
 0xede   :  { %769 = vrot.lane.b32.xlu1 %v767_v3, %s1425_s5 }
 0xf50   :  { %v770_v4 = vpop.permute.xlu1 %769 }
 0xf51   :  { %v772_v56 = vadd.f32 %v770_v4, %v762_v8 }
 0xf53   :  { %1372 = vtanh.f32 %v772_v56 }
 0xf60   :  { %v1373_v6 = vpop.eup %1372 }
 0xf61   :  { %775 = vrot.lane.b32.xlu0 %v1373_v6, %s1424_s21 }
 0xfd3   :  { %v776_v9 = vpop.permute.xlu0 %775 }
 0xfd4   :  { %v778_v11 = vmul.f32 %v1371_v7, %v776_v9 }
 0xfd6   :  { %780 = vrot.lane.b32.xlu1 %v778_v11, %s1425_s5 }
0x1048   :  { %v781_v12 = vpop.permute.xlu1 %780 }
0x1049   :  { %1307 = vmatmul.mubr.msk.f32.vlgmr.msra.gmra.mxu0 %vm180_vm2, %v781_v12 }
0x1109   :  { %v850_v14 = vpop.f32.mrf.mxu0 }
0x110a   :  { %v854_v15 = vadd.f32 %v850_v14, %v168_v13 }
0x110b   :  { %v1308_v16 = vpop.f32.mrf.mxu0 }
0x110c   :  { %1374 = vtanh.f32 %v854_v15  ;;  %v1148_v18 = vmul.f32 -1.442695, %v854_v15 }
0x110e   :  { %1376 = vpow2.f32 %v1148_v18 }
0x1119   :  { %v1375_v17 = vpop.eup %1374 }
0x111a   :  { %864 = vrot.lane.b32.xlu0 %v1375_v17, %s1424_s21 }
0x111b   :  { %v1377_v19 = vpop.eup %1376 }
0x111c   :  { %v858_v20 = vadd.f32 1.0, %v1377_v19 }
0x111e   :  { %1378 = vrcp.f32 %v858_v20 }
0x112b   :  { %v1379_v21 = vpop.eup %1378 }
0x112c   :  { %v862_v24 = vmul.f32 %v1379_v21, %v772_v56 }
0x118c   :  { %v865_v22 = vpop.permute.xlu0 %864 }
0x118d   :  { %v867_v23 = vmul.f32 %v1379_v21, %v865_v22 }
0x118f   :  { %869 = vrot.lane.b32.xlu1 %v867_v23, %s1425_s5 }
0x1201   :  { %v870_v25 = vpop.permute.xlu1 %869 }
0x1202   :  { %v872_v59 = vadd.f32 %v870_v25, %v862_v24 }
0x1204   :  { %1380 = vtanh.f32 %v872_v59 }
0x1211   :  { %v1381_v26 = vpop.eup %1380 }
0x1212   :  { %875 = vrot.lane.b32.xlu0 %v1381_v26, %s1424_s21 }
0x1284   :  { %v876_v27 = vpop.permute.xlu0 %875 }
0x1285   :  { %v878_v28 = vmul.f32 %v1379_v21, %v876_v27 }
0x1287   :  { %880 = vrot.lane.b32.xlu1 %v878_v28, %s1425_s5 }
0x12f9   :  { %v881_v29 = vpop.permute.xlu1 %880 }
0x12fa   :  { %1318 = vmatmul.mubr.msk.f32.vlgmr.msra.gmra.mxu1 %vm180_vm2, %v881_v29 }
0x13ba   :  { %v950_v31 = vpop.f32.mrf.mxu1 }
0x13bb   :  { %v954_v32 = vadd.f32 %v950_v31, %v173_v30 }
0x13bc   :  { %v1319_v33 = vpop.f32.mrf.mxu1 }
0x13bd   :  { %1382 = vtanh.f32 %v954_v32  ;;  %v1150_v35 = vmul.f32 -1.442695, %v954_v32 }
0x13bf   :  { %1384 = vpow2.f32 %v1150_v35 }
0x13ca   :  { %v1383_v34 = vpop.eup %1382 }
0x13cb   :  { %964 = vrot.lane.b32.xlu0 %v1383_v34, %s1424_s21 }
0x13cc   :  { %v1385_v36 = vpop.eup %1384 }
0x13cd   :  { %v958_v37 = vadd.f32 1.0, %v1385_v36 }
0x13cf   :  { %1386 = vrcp.f32 %v958_v37 }
0x13dc   :  { %v1387_v38 = vpop.eup %1386 }
0x13dd   :  { %v962_v41 = vmul.f32 %v1387_v38, %v872_v59 }
0x143d   :  { %v965_v39 = vpop.permute.xlu0 %964 }
0x143e   :  { %v967_v40 = vmul.f32 %v1387_v38, %v965_v39 }
0x1440   :  { %969 = vrot.lane.b32.xlu1 %v967_v40, %s1425_s5 }
0x14b2   :  { %v970_v42 = vpop.permute.xlu1 %969 }
0x14b3   :  { %v972_v10 = vadd.f32 %v970_v42, %v962_v41 }
0x14b5   :  { %1388 = vtanh.f32 %v972_v10 }
0x14c2   :  { %v1389_v58 = vpop.eup %1388 }
0x14c3   :  { %975 = vrot.lane.b32.xlu0 %v1389_v58, %s1424_s21  ;;  %s991_s21 = scalar_lea.vmem [#allocation2], %s1151_s9 }
0x1535   :  { %v976_v43 = vpop.permute.xlu0 %975 }
0x1536   :  { %v978_v44 = vmul.f32 %v1387_v38, %v976_v43 }
0x1538   :  { %980 = vrot.lane.b32.xlu1 %v978_v44, %s1425_s5  ;;  %s997_s5 = scalar_lea.vmem [#allocation2], %s1153_s11 }
0x15aa   :  { %v981_v45 = vpop.permute.xlu1 %980 }
0x15ab   :  { %983 = vst.msk [vmem:[#allocation2] sm:$0xff] %vm180_vm2, %v981_v45 }
0x15b2   :  { %v992_v46 = vld [vmem:[%s991_s21] sm:$0x1] }
0x15b3   :  { %v998_v47 = vld [vmem:[%s997_s5] sm:$0x1]  ;;  %v1033_v53 = vrot.slane %v992_v46, 7 }
0x15b4   :  { %v995_v48 = vld [vmem:[%s994_s22] sm:$0x1]  ;;  %v1036_v54 = vrot.slane %v998_v47, 6 }
0x15b5   :  { %v1001_v49 = vld [vmem:[%s1000_s23] sm:$0x1]  ;;  %v1068_v1 = vrot.slane %v995_v48, 7 }
0x15b6   :  { %v1004_v50 = vld [vmem:[%s1003_s24] sm:$0x1]  ;;  %v1071_v0 = vrot.slane %v1001_v49, 6 }
0x15b7   :  { %v986_v51 = vld [vmem:[%s985_s25] sm:$0x1]  ;;  %v1039_v63 = vrot.slane %v1004_v50, 5 }
0x15b8   :  { %v1010_v52 = vld [vmem:[%s1009_s26] sm:$0x1]  ;;  %v1054_v5 = vsel %vm1053_vm3, %v986_v51, %v1033_v53 }
0x15b9   :  { %v989_v55 = vld [vmem:[%s988_s27] sm:$0x1]  ;;  %v1042_v3 = vrot.slane %v1010_v52, 4  ;;  %v1056_v8 = vsel %vm1055_vm4, %v1054_v5, %v1036_v54 }
0x15ba   :  { %v1007_v57 = vld [vmem:[%s1006_s28] sm:$0x1]  ;;  %v1058_v6 = vsel %vm1057_vm5, %v1056_v8, %v1039_v63  ;;  %v1088_v11 = vsel %vm1053_vm3, %v989_v55, %v1068_v1 }
0x15bb   :  { %v1016_v60 = vld [vmem:[%s1015_s29] sm:$0x1]  ;;  %v1074_v9 = vrot.slane %v1007_v57, 5  ;;  %v1060_v14 = vsel %vm1059_vm6, %v1058_v6, %v1042_v3  ;;  %v1089_v16 = vsel %vm1055_vm4, %v1088_v11, %v1071_v0 }
0x15bc   :  { %v1013_v61 = vld [vmem:[%s1012_s0] sm:$0x1]  ;;  %v1045_v56 = vrot.slane %v1016_v60, 3 }
0x15bd   :  { %v1022_v62 = vld [vmem:[%s1021_s1] sm:$0x1]  ;;  %v1077_v15 = vrot.slane %v1013_v61, 4  ;;  %v1090_v20 = vsel %vm1057_vm5, %v1089_v16, %v1074_v9 }
0x15be   :  { %v1019_v7 = vld [vmem:[%s1018_s30] sm:$0x1]  ;;  %v1048_v13 = vrot.slane %v1022_v62, 2  ;;  %v1062_v18 = vsel %vm1061_vm7, %v1060_v14, %v1045_v56 }
0x15bf   :  { %v1028_v2 = vld [vmem:[%s1027_s7] sm:$0x1]  ;;  %v1080_v19 = vrot.slane %v1019_v7, 3  ;;  %v1091_v23 = vsel %vm1059_vm6, %v1090_v20, %v1077_v15 }
0x15c0   :  { %v1025_v4 = vld [vmem:[%s1024_s2] sm:$0x1]  ;;  %v1051_v17 = vrot.slane %v1028_v2, 1  ;;  %v1064_v21 = vsel %vm1063_vm8, %v1062_v18, %v1048_v13 }
0x15c1   :  { %v1031_v12 = vld [vmem:[%s1030_s8] sm:$0x1]  ;;  %v1083_v22 = vrot.slane %v1025_v4, 2  ;;  %v1092_v59 = vsel %vm1061_vm7, %v1091_v23, %v1080_v19 }
0x15c2   :  { %v1066_v24 = vsel %vm1065_vm9, %v1064_v21, %v1051_v17  ;;  %v1086_v25 = vrot.slane %v1031_v12, 1 }
0x15c3   :  { %v1093_v26 = vsel %vm1063_vm8, %v1092_v59, %v1083_v22 }
0x15c4   :  { %v1094_v27 = vsel %vm1065_vm9, %v1093_v26, %v1086_v25 }
0x15c5   :  { %v1095_v28 = vmul.f32 %v1094_v27, %v1066_v24 }
0x15c7   :  { %v1096_v29 = vsel %vm180_vm2, %v1095_v28, 0.0 }
0x15c8   :  { %1097 = vadd.xlane.f32.xlu0 %v1096_v29 }
0x1651   :  { %v1098_v30 = vpop.xlane.xlu0 %1097 }
0x1652   :  { %v1165_v31 = vmul.f32 -1.442695, %v1098_v30 }
0x1654   :  { %1390 = vpow2.f32 %v1165_v31 }
0x1661   :  { %v1391_v32 = vpop.eup %1390 }
0x1662   :  { %v1102_v33 = vadd.f32 1.0, %v1391_v32 }
0x1664   :  { %1392 = vrcp.f32 %v1102_v33 }
0x1671   :  { %v1393_v34 = vpop.eup %1392 }
0x1672   :  { %1106 = vst.msk [vmem:[%s1727_s6] sm:$0xff] %vm1105_vm10, %v1393_v34 }

</bundles_post_ra>
